<compile_context>
chip_gen: v7x
topology: tpu7x:2x2x1
jax: 0.10.0
libtpu: 0.0.40
codegen_flags: <defaults>
</compile_context>

<pallas_src>
import jax
import jax.numpy as jnp
from jax import lax
from jax.experimental import pallas as pl
from jax.experimental.pallas import tpu as pltpu


def _alpha_kernel(q_ref, w_ref, b_ref, k_ref, alpha_ref):
    """One (batch-tile, seq-tile) block of temp_alpha = exp((key @ tanh(qW+b)^T)^T)."""
    tb = q_ref.shape[0]
    w = w_ref[...]         # (E, H) -- already transposed in the wrapper
    bias = b_ref[...]      # (1, H)

    # Static unroll over the batch tile; iterations are independent so the
    # scheduler interleaves the dots / tanh / exp freely.
    for b in range(tb):
        # temp_query = tanh(query @ W + b)            -> (C, H)
        tq = jnp.tanh(
            jnp.dot(q_ref[b], w, preferred_element_type=jnp.float32) + bias
        )
        # temp_alpha block = (key @ temp_query^T)^T   -> (C, tS)  (lane-dense)
        scores = lax.dot_general(
            tq, k_ref[b], (((1,), (1,)), ((), ())),
            preferred_element_type=jnp.float32,
        )
        alpha_ref[b] = jnp.exp(scores)


def _pick_tiles(B, S, H, C, E, budget_bytes=32 << 20):
    """Choose (tb, ts): lane-dense S tile (multiple of 128 or full S) and a
    batch tile that amortizes per-step overhead, clamped to a VMEM budget."""
    ts = S if S <= 512 else 512
    tb = max(1, min(B, 8))

    def nbytes(tb_, ts_):
        per_step = tb_ * (ts_ * H + C * ts_ + C * E) * 4   # key + alpha + query
        fixed = (E * H + H) * 4                            # weight + bias
        return 2 * (per_step + fixed)                      # double buffering

    while tb > 1 and nbytes(tb, ts) > budget_bytes:
        tb //= 2
    while ts > 128 and nbytes(tb, ts) > budget_bytes:
        ts = max(128, ((ts // 2) // 128) * 128)
    return tb, ts


def attention_layer(key, value, query, seq_len, weight, bias):
    # value == key in this module; only its shape feeds getMask.
    del value
    B, S, H = key.shape
    _, C, E = query.shape

    tb, ts = _pick_tiles(B, S, H, C, E)

    w_eh = weight.T                 # (E, H): hoist the transpose out of the kernel
    bias2d = bias.reshape(1, H)

    grid = (pl.cdiv(B, tb), pl.cdiv(S, ts))
    grid_spec = pltpu.PrefetchScalarGridSpec(
        num_scalar_prefetch=0,
        grid=grid,
        in_specs=[
            pl.BlockSpec((tb, C, E), lambda bi, si: (bi, 0, 0)),    # query
            pl.BlockSpec((E, H), lambda bi, si: (0, 0)),            # weight (E, H)
            pl.BlockSpec((1, H), lambda bi, si: (0, 0)),            # bias
            pl.BlockSpec((tb, ts, H), lambda bi, si: (bi, si, 0)),  # key
        ],
        out_specs=pl.BlockSpec((tb, C, ts), lambda bi, si: (bi, 0, si)),
    )

    temp_alpha = pl.pallas_call(
        _alpha_kernel,
        out_shape=jax.ShapeDtypeStruct((B, C, S), jnp.float32),
        grid_spec=grid_spec,
        compiler_params=pltpu.CompilerParams(
            dimension_semantics=("parallel", "parallel"),
            vmem_limit_bytes=48 << 20,
        ),
    )(query, w_eh, bias2d, key)

    # getMask + repeat over ca_num: identical for every ca -> cheap broadcast
    # outside the kernel (avoids B*C*S redundant f32 HBM writes).
    mask = jnp.broadcast_to(
        (jnp.arange(S, dtype=jnp.int32)[None, None, :]
         < seq_len.astype(jnp.int32)[:, None, None]).astype(jnp.float32),
        (B, C, S),
    )
    return temp_alpha, mask


if __name__ == "__main__":
    B, S, H = 2, 8, 32       # batch, max_seq_len, hidden_size (= out_dim)
    C, E = 4, 16             # ca_num, embedding_dim (= in_dim)

    root = jax.random.PRNGKey(0)
    k1, k2, k3, k4 = jax.random.split(root, 4)

    key = jax.random.normal(k1, (B, S, H), dtype=jnp.float32) * 0.5
    value = key
    query = jax.random.normal(k2, (B, C, E), dtype=jnp.float32) * 0.5
    seq_len = jnp.array([5, 8], dtype=jnp.int32)

    # deterministic "Linear(in_dim=E, out_dim=H)" parameters
    weight = jax.random.normal(k3, (H, E), dtype=jnp.float32) * 0.1
    bias = jax.random.normal(k4, (H,), dtype=jnp.float32) * 0.1

    alpha, mask = attention_layer(key, value, query, seq_len, weight, bias)
    jax.block_until_ready((alpha, mask))

    # reference (pure JAX) check
    tq_ref = jnp.tanh(jnp.einsum("bce,he->bch", query, weight) + bias)
    alpha_ref = jnp.exp(jnp.einsum("bsh,bch->bcs", key, tq_ref))
    mask_ref = jnp.broadcast_to(
        (jnp.arange(S)[None, None, :] < seq_len[:, None, None]).astype(jnp.float32),
        (B, C, S))

    assert jnp.allclose(alpha, alpha_ref, atol=1e-4, rtol=1e-4), "alpha mismatch"
    assert jnp.allclose(mask, mask_ref), "mask mismatch"

    print("KERNEL_OK")
</pallas_src>

<mosaic_0001>
module attributes {stable_mosaic.version = 11 : i64} {
  func.func @_alpha_kernel(%arg0: i32, %arg1: i32, %arg2: memref<2x4x16xf32, #tpu.memory_space<vmem>>, %arg3: memref<16x32xf32, #tpu.memory_space<vmem>>, %arg4: memref<1x32xf32, #tpu.memory_space<vmem>>, %arg5: memref<2x8x32xf32, #tpu.memory_space<vmem>>, %arg6: memref<2x4x8xf32, #tpu.memory_space<vmem>>) attributes {dimension_semantics = [#tpu.dimension_semantics<parallel>, #tpu.dimension_semantics<parallel>], iteration_bounds = array<i64: 1, 1>, scalar_prefetch = 0 : i64, scratch_operands = 0 : i64, tpu.core_type = #tpu.core_type<tc>, window_params = [{transform_indices = @transform_0, window_bounds = array<i64: 2, 4, 16>}, {pipeline_mode = #tpu.pipeline_mode<synchronous>, transform_indices = @transform_1, window_bounds = array<i64: 16, 32>}, {pipeline_mode = #tpu.pipeline_mode<synchronous>, transform_indices = @transform_2, window_bounds = array<i64: 1, 32>}, {transform_indices = @transform_3, window_bounds = array<i64: 2, 8, 32>}, {transform_indices = @transform_4, window_bounds = array<i64: 2, 4, 8>}]} {
    %c0 = arith.constant 0 : index
    %c0_0 = arith.constant 0 : index
    %0 = vector.load %arg3[%c0, %c0_0] : memref<16x32xf32, #tpu.memory_space<vmem>>, vector<16x32xf32>
    %c0_1 = arith.constant 0 : index
    %c0_2 = arith.constant 0 : index
    %1 = vector.load %arg4[%c0_1, %c0_2] : memref<1x32xf32, #tpu.memory_space<vmem>>, vector<1x32xf32>
    %c0_3 = arith.constant 0 : index
    %c0_4 = arith.constant 0 : index
    %c0_5 = arith.constant 0 : index
    %2 = vector.load %arg2[%c0_3, %c0_4, %c0_5] : memref<2x4x16xf32, #tpu.memory_space<vmem>>, vector<1x4x16xf32>
    %3 = vector.shape_cast %2 : vector<1x4x16xf32> to vector<4x16xf32>
    %cst = arith.constant dense<0.000000e+00> : vector<4x32xf32>
    %4 = tpu.matmul %3, %0, %cst {dimension_numbers = #tpu.dot_dimension_numbers<[1], [0], [0], [1], [0, 0, 1, 1], [], []>} : vector<4x16xf32>, vector<16x32xf32>, vector<4x32xf32> -> vector<4x32xf32>
    %5 = vector.broadcast %1 : vector<1x32xf32> to vector<4x32xf32>
    %6 = arith.addf %4, %5 : vector<4x32xf32>
    %7 = math.tanh %6 : vector<4x32xf32>
    %c0_6 = arith.constant 0 : index
    %c0_7 = arith.constant 0 : index
    %c0_8 = arith.constant 0 : index
    %8 = vector.load %arg5[%c0_6, %c0_7, %c0_8] : memref<2x8x32xf32, #tpu.memory_space<vmem>>, vector<1x8x32xf32>
    %9 = vector.shape_cast %8 : vector<1x8x32xf32> to vector<8x32xf32>
    %cst_9 = arith.constant dense<0.000000e+00> : vector<4x8xf32>
    %10 = tpu.matmul %7, %9, %cst_9 {dimension_numbers = #tpu.dot_dimension_numbers<[1], [1], [0], [0], [0, 0, 1, 0], [], []>} : vector<4x32xf32>, vector<8x32xf32>, vector<4x8xf32> -> vector<4x8xf32>
    %11 = math.exp %10 : vector<4x8xf32>
    %c0_10 = arith.constant 0 : index
    %c0_11 = arith.constant 0 : index
    %c0_12 = arith.constant 0 : index
    %12 = vector.load %arg6[%c0_10, %c0_11, %c0_12] : memref<2x4x8xf32, #tpu.memory_space<vmem>>, vector<1x4x8xf32>
    %13 = vector.shape_cast %12 : vector<1x4x8xf32> to vector<4x8xf32>
    %14 = vector.shape_cast %11 : vector<4x8xf32> to vector<1x4x8xf32>
    tpu.vector_store %arg6[%c0_10, %c0_11, %c0_12], %14 {strides = array<i32>} : memref<2x4x8xf32, #tpu.memory_space<vmem>>, vector<1x4x8xf32>,
    %c1 = arith.constant 1 : index
    %c0_13 = arith.constant 0 : index
    %c0_14 = arith.constant 0 : index
    %15 = vector.load %arg2[%c1, %c0_13, %c0_14] : memref<2x4x16xf32, #tpu.memory_space<vmem>>, vector<1x4x16xf32>
    %16 = vector.shape_cast %15 : vector<1x4x16xf32> to vector<4x16xf32>
    %cst_15 = arith.constant dense<0.000000e+00> : vector<4x32xf32>
    %17 = tpu.matmul %16, %0, %cst_15 {dimension_numbers = #tpu.dot_dimension_numbers<[1], [0], [0], [1], [0, 0, 1, 1], [], []>} : vector<4x16xf32>, vector<16x32xf32>, vector<4x32xf32> -> vector<4x32xf32>
    %18 = vector.broadcast %1 : vector<1x32xf32> to vector<4x32xf32>
    %19 = arith.addf %17, %18 : vector<4x32xf32>
    %20 = math.tanh %19 : vector<4x32xf32>
    %c1_16 = arith.constant 1 : index
    %c0_17 = arith.constant 0 : index
    %c0_18 = arith.constant 0 : index
    %21 = vector.load %arg5[%c1_16, %c0_17, %c0_18] : memref<2x8x32xf32, #tpu.memory_space<vmem>>, vector<1x8x32xf32>
    %22 = vector.shape_cast %21 : vector<1x8x32xf32> to vector<8x32xf32>
    %cst_19 = arith.constant dense<0.000000e+00> : vector<4x8xf32>
    %23 = tpu.matmul %20, %22, %cst_19 {dimension_numbers = #tpu.dot_dimension_numbers<[1], [1], [0], [0], [0, 0, 1, 0], [], []>} : vector<4x32xf32>, vector<8x32xf32>, vector<4x8xf32> -> vector<4x8xf32>
    %24 = math.exp %23 : vector<4x8xf32>
    %c1_20 = arith.constant 1 : index
    %c0_21 = arith.constant 0 : index
    %c0_22 = arith.constant 0 : index
    %25 = vector.load %arg6[%c1_20, %c0_21, %c0_22] : memref<2x4x8xf32, #tpu.memory_space<vmem>>, vector<1x4x8xf32>
    %26 = vector.shape_cast %25 : vector<1x4x8xf32> to vector<4x8xf32>
    %27 = vector.shape_cast %24 : vector<4x8xf32> to vector<1x4x8xf32>
    tpu.vector_store %arg6[%c1_20, %c0_21, %c0_22], %27 {strides = array<i32>} : memref<2x4x8xf32, #tpu.memory_space<vmem>>, vector<1x4x8xf32>,
    return
  }
  func.func @transform_0(%arg0: i32, %arg1: i32) -> (i32, i32, i32) {
    %c0_i32 = arith.constant 0 : i32
    %c0_i32_0 = arith.constant 0 : i32
    %c0_i32_1 = arith.constant 0 : i32
    return %arg0, %c0_i32, %c0_i32_0 : i32, i32, i32
  }
  func.func @transform_1(%arg0: i32, %arg1: i32) -> (i32, i32) {
    %c0_i32 = arith.constant 0 : i32
    %c0_i32_0 = arith.constant 0 : i32
    %c0_i32_1 = arith.constant 0 : i32
    return %c0_i32, %c0_i32_0 : i32, i32
  }
  func.func @transform_2(%arg0: i32, %arg1: i32) -> (i32, i32) {
    %c0_i32 = arith.constant 0 : i32
    %c0_i32_0 = arith.constant 0 : i32
    %c0_i32_1 = arith.constant 0 : i32
    return %c0_i32, %c0_i32_0 : i32, i32
  }
  func.func @transform_3(%arg0: i32, %arg1: i32) -> (i32, i32, i32) {
    %c0_i32 = arith.constant 0 : i32
    %c0_i32_0 = arith.constant 0 : i32
    return %arg0, %arg1, %c0_i32 : i32, i32, i32
  }
  func.func @transform_4(%arg0: i32, %arg1: i32) -> (i32, i32, i32) {
    %c0_i32 = arith.constant 0 : i32
    %c0_i32_0 = arith.constant 0 : i32
    return %arg0, %c0_i32, %arg1 : i32, i32, i32
  }
}

</mosaic_0001>

<bundles_post_ra>
// kernel: tpu_custom_call.1
= control target key start
LH: loop header
LB: loop body
LE: loop exit
PB: predicated region body
PF: predicated region fallthrough
CT: control target
= control target key end

     0   :  { %9 = vsyncpa [#allocation3], 0  ;;  %s669_s0 = inlined_call_operand.hbm [shape: f32[2,4,16], index: 0, kind: input, shape index: {}]   ;;  %s670_s1 = inlined_call_operand.hbm [shape: f32[16,32], index: 1, kind: input, shape index: {}]   ;;  %s671_s2 = inlined_call_operand.vmem [shape: f32[1,32], index: 2, kind: input, shape index: {}]   ;;  %s672_s3 = inlined_call_operand.hbm [shape: f32[2,8,32], index: 3, kind: input, shape index: {}]   ;;  %s673_s4 = inlined_call_operand.hbm [shape: f32[2,4,8], index: 4, kind: output, shape index: {}]  }
   0x1   :  { %10 = vsyncpa [#allocation6], 0 }
   0x2   :  { %11 = vsyncpa [#allocation4], 0  ;;  %s562_s15 = smov [#allocation5]   ;;  %s468_s19 = scalar_lea.hbm %s670_s1, 256 }
   0x3   :  { %s29_s16 = sshll.u32 %s562_s15, 4  ;;  %p469_p0 = scmp.ne.s32.totalorder %s670_s1, %s468_s19  ;;  %s30_s16 = int_to_ptr.vmem [resolvable:$true] %s29_s16 }
   0x4   :  { %p472_p1 = scmp.lt.u32.totalorder %s468_s19, %s670_s1 }
   0x6   :  { %p474_p2 = pnand %p472_p1, %p469_p0 }
   0x8   :  { %477 = shalt.err (!%p474_p2)
}
   0x9   :  { %s478_s24 = scalar_lea.vmem %s30_s16, 256  ;;  %p483_p4 = scmp.lt.s32.totalorder %s30_s16, %s30_s16 }
   0xa   :  { %p479_p3 = scmp.ne.s32.totalorder %s30_s16, %s478_s24  ;;  %p484_p5 = scmp.lt.s32.totalorder %s478_s24, %s478_s24 }
   0xc   :  { %p485_p6 = por %p484_p5, %p483_p4 }
   0xe   :  { %p486_p7 = pnand %p485_p6, %p479_p3 }
  0x10   :  { %489 = shalt.err (!%p486_p7)
}
  0x11   :  { %s563_s25 = smov 128   ;;  %s564_s26 = smov 8  }
  0x12   :  { %35 = dma.hbm_to_vmem [thread:$0]  %s670_s1, 256, %s30_s16, [#allocation6], %s563_s25, %s563_s25, %s564_s26  }
  0x13   :  { %s565_s29 = smov [#allocation2]   ;;  %s490_s7 = scalar_lea.hbm %s669_s0, 128 }
  0x14   :  { %s17_s30 = sshll.u32 %s565_s29, 4  ;;  %p491_p8 = scmp.ne.s32.totalorder %s669_s0, %s490_s7  ;;  %s18_s30 = int_to_ptr.vmem [resolvable:$true] %s17_s30 }
  0x15   :  { %p494_p9 = scmp.lt.u32.totalorder %s490_s7, %s669_s0 }
  0x17   :  { %p496_p10 = pnand %p494_p9, %p491_p8 }
  0x19   :  { %499 = shalt.err (!%p496_p10)
}
  0x1a   :  { %s500_s12 = scalar_lea.vmem %s18_s30, 128  ;;  %p505_p12 = scmp.lt.s32.totalorder %s18_s30, %s18_s30 }
  0x1b   :  { %p501_p11 = scmp.ne.s32.totalorder %s18_s30, %s500_s12  ;;  %p506_p13 = scmp.lt.s32.totalorder %s500_s12, %s500_s12 }
  0x1d   :  { %p507_p0 = por %p506_p13, %p505_p12 }
  0x1f   :  { %p508_p1 = pnand %p507_p0, %p501_p11 }
  0x21   :  { %511 = shalt.err (!%p508_p1)
}
  0x22   :  { %s566_s1 = smov 64   ;;  %s567_s13 = smov 4  }
  0x23   :  { %23 = dma.hbm_to_vmem [thread:$0]  %s669_s0, 128, %s18_s30, [#allocation3], %s566_s1, %s566_s1, %s567_s13  }
  0x24   :  { %s568_s16 = smov [#allocation7]   ;;  %s512_s20 = scalar_lea.hbm %s672_s3, 256 }
  0x25   :  { %s43_s17 = sshll.u32 %s568_s16, 4  ;;  %p513_p2 = scmp.ne.s32.totalorder %s672_s3, %s512_s20  ;;  %s44_s17 = int_to_ptr.vmem [resolvable:$true] %s43_s17 }
  0x26   :  { %p516_p3 = scmp.lt.u32.totalorder %s512_s20, %s672_s3 }
  0x28   :  { %p518_p4 = pnand %p516_p3, %p513_p2 }
  0x2a   :  { %521 = shalt.err (!%p518_p4)
}
  0x2b   :  { %s522_s27 = scalar_lea.vmem %s44_s17, 256  ;;  %p527_p6 = scmp.lt.s32.totalorder %s44_s17, %s44_s17 }
  0x2c   :  { %p523_p5 = scmp.ne.s32.totalorder %s44_s17, %s522_s27  ;;  %p528_p7 = scmp.lt.s32.totalorder %s522_s27, %s522_s27 }
  0x2e   :  { %p529_p8 = por %p528_p7, %p527_p6 }
  0x30   :  { %p530_p9 = pnand %p529_p8, %p523_p5 }
  0x32   :  { %533 = shalt.err (!%p530_p9)
}
  0x33   :  { %49 = dma.hbm_to_vmem [thread:$0]  %s672_s3, 256, %s44_s17, [#allocation6], %s563_s25, %s563_s25, %s564_s26  }
  0x34   :  { %556 = dma.done.wait [#allocation3], 128  }
  0x35   :  { %557 = vsyncadd [#allocation3], 4294967168 }
  0x36   :  { %558 = dma.done.wait [#allocation6], 512  }
  0x37   :  { %559 = vsyncadd [#allocation6], 4294966784  ;;  %v569_v0 = vmov 0.0|0.0   ;;  %vm570_vm0 = vmmov 0   ;;  %v571_v1 = vmov 0.0   ;;  %v59_v2 = vld [vmem:[#allocation5] sm:$0xff] }
  0x38   :  { %443 = vmatprep.subr.bf16.mxu0 %v569_v0  ;;  %423 = vmatprep.mubr.msk.f32.mxu0 %vm570_vm0, %v571_v1  ;;  %v60_v3 = vld [vmem:[#allocation5 + $0x8] sm:$0xff]  ;;  %v62_v5 = vld [vmem:[#allocation2] sm:$0xf]  ;;  %vm69_vm1 = vcmask 130048   ;;  %v227_v6 = vld [vmem:[#allocation2 + $0x4] sm:$0xf] }
  0x39   :  { %426 = vmatprep.subr.mxu1 %v571_v1  ;;  %428 = vmatprep.mubr.msk.f32.mxu1 %vm570_vm0, %v571_v1  ;;  %v444_v4 = vpack.c.bf16 %v60_v3, %v59_v2  ;;  %v144_v7 = vld [vmem:[#allocation7] sm:$0xff]  ;;  %vm145_vm2 = vcmask 261120   ;;  %v402_v8 = vld [vmem:[%s671_s2] ss:$0 sm:$0xff]  ;;  %vm224_vm3 = vcmask 60416   ;;  %s572_s2 = smov [#allocation8]  }
  0x3a   :  { %427 = vmatpush3.xpose.msk.msra.mxu1 %vm145_vm2, %v144_v7  ;;  %v303_v15 = vld [vmem:[#allocation7 + $0x8] sm:$0xff]  ;;  %s389_s26 = sshll.u32 %s572_s2, 4  ;;  %s390_s26 = int_to_ptr.vmem [resolvable:$true] %s389_s26 }
  0x3b   :  { %445 = vmatpush3.bf16.msra.mxu0 %v444_v4  ;;  %438 = vmatprep.subr.mxu1 %v571_v1  ;;  %s534_s29 = scalar_lea.vmem %s390_s26, 128  ;;  %p539_p11 = scmp.lt.s32.totalorder %s390_s26, %s390_s26 }
  0x3c   :  { %446 = vmatprep.subr.bf16.mxu0 %v569_v0  ;;  %p535_p10 = scmp.ne.s32.totalorder %s390_s26, %s534_s29  ;;  %p540_p12 = scmp.lt.s32.totalorder %s534_s29, %s534_s29 }
  0x3e   :  { %424 = vmatmul.mubr.msk.f32.vlgmr.msra.gmra.mrb[0].mxu0 %vm69_vm1, %v62_v5  ;;  %p541_p13 = por %p540_p12, %p539_p11 }
  0x3f   :  { %448 = vmatpush3.bf16.msra.mxu0 %v444_v4  ;;  %435 = vmatprep.mubr.msk.f32.mxu0 %vm570_vm0, %v571_v1 }
  0x40   :  { %p542_p0 = pnand %p541_p13, %p535_p10 }
  0x42   :  { %436 = vmatmul.mubr.msk.f32.vlgmr.msra.gmra.mrb[2].mxu0 %vm69_vm1, %v227_v6 }
 0x111   :  { %v139_v9 = vpop.f32.mrb[0].mxu0 }
 0x112   :  { %v140_v10 = vadd.f32 %v402_v8, %v139_v9  ;;  %v425_v11 = vpop.f32.mrb[1].mxu0 }
 0x114   :  { %460 = vtanh.f32 %v140_v10 }
 0x115   :  { %v297_v12 = vpop.f32.mrb[2].mxu0 }
 0x116   :  { %v298_v13 = vadd.f32 %v402_v8, %v297_v12  ;;  %v437_v14 = vpop.f32.mrb[3].mxu0 }
 0x118   :  { %462 = vtanh.f32 %v298_v13 }
 0x11e   :  { %v461_v16 = vpop.eup %460 }
 0x11f   :  { %429 = vmatmul.mubr.msk.f32.vlgmr.msra.gmra.mrb[0].mxu1 %vm145_vm2, %v461_v16 }
 0x120   :  { %439 = vmatpush3.xpose.msk.msra.mxu1 %vm145_vm2, %v303_v15  ;;  %440 = vmatprep.mubr.msk.f32.mxu1 %vm570_vm0, %v571_v1 }
 0x122   :  { %v463_v17 = vpop.eup %462 }
 0x123   :  { %441 = vmatmul.mubr.msk.f32.vlgmr.msra.gmra.mrb[2].mxu1 %vm145_vm2, %v463_v17 }
 0x1f2   :  { %v218_v18 = vpop.f32.mrb[0].mxu1 }
 0x1f3   :  { %v222_v19 = vmul.f32 1.442695, %v218_v18  ;;  %v430_v20 = vpop.f32.mrb[1].mxu1 }
 0x1f5   :  { %464 = vpow2.f32 %v222_v19 }
 0x1f6   :  { %v376_v21 = vpop.f32.mrb[2].mxu1 }
 0x1f7   :  { %v380_v22 = vmul.f32 1.442695, %v376_v21  ;;  %v442_v23 = vpop.f32.mrb[3].mxu1 }
 0x1f9   :  { %466 = vpow2.f32 %v380_v22 }
 0x1ff   :  { %v465_v24 = vpop.eup %464 }
 0x200   :  { %225 = vst.msk [vmem:[#allocation8] sm:$0xf] %vm224_vm3, %v465_v24 }
 0x203   :  { %v467_v25 = vpop.eup %466 }
 0x204   :  { %383 = vst.msk [vmem:[#allocation8 + $0x4] sm:$0xf] %vm224_vm3, %v467_v25 }
 0x205   :  { %545 = shalt.err (!%p542_p0)
}
 0x206   :  { %s546_s6 = scalar_lea.hbm %s673_s4, 128 }
 0x207   :  { %p547_p1 = scmp.ne.s32.totalorder %s673_s4, %s546_s6  ;;  %p550_p2 = scmp.lt.u32.totalorder %s546_s6, %s673_s4 }
 0x209   :  { %p552_p3 = pnand %p550_p2, %p547_p1 }
 0x20b   :  { %555 = shalt.err (!%p552_p3)
}
 0x20c   :  { %395 = dma.vmem_to_hbm [thread:$0]  %s390_s26, 128, %s673_s4, [#allocation4], %s566_s1, %s566_s1, %s567_s13  }
 0x20d   :  { %560 = dma.done.wait [#allocation4], 128  }
 0x20e   :  { %561 = vsyncadd [#allocation4], 4294967168 }
 0x20f   :  { %399 = vsyncpa [#allocation3], 1 }
 0x210   :  { %400 = vsyncpa [#allocation6], 1 }
 0x211   :  { %401 = vsyncpa [#allocation4], 1 }

</bundles_post_ra>
